<compile_context>
chip_gen: v7x
topology: tpu7x:2x2x1
jax: 0.10.0
libtpu: 0.0.40
codegen_flags: <defaults>
</compile_context>

<pallas_src>
import functools

import jax
import jax.numpy as jnp
from jax.experimental import pallas as pl
from jax.experimental.pallas import tpu as pltpu

LANE = 128      # vreg lane width (last dim)
SUBLANE = 8     # f32 sublane granularity (second-to-last dim)

# MXU operand dtype. bf16 ~= 1e-2 rel. error vs the PyTorch f32 module (accumulation
# and epilogue stay f32). Use jnp.float32 for bit-faithful-ish semantics.
MATMUL_DTYPE = jnp.bfloat16


def _round_up(x, m):
    return (x + m - 1) // m * m


def _cdiv(a, b):
    return -(-a // b)


# ----------------------------------------------------------------------------- kernel
def mlp_kernel(x_ref, w1_ref, b1_ref, w2_ref, b2_ref, w3_ref, b3_ref, o_ref):
    # fc1 + ReLU: MXU matmul with f32 accumulation; bias/ReLU epilogue in f32 with the
    # down-cast fused onto the ReLU so the f32 intermediate's live range ends here.
    x = x_ref[...].astype(MATMUL_DTYPE)
    h1 = jnp.dot(x, w1_ref[...], preferred_element_type=jnp.float32)
    h1 = jnp.maximum(h1 + b1_ref[...], 0.0).astype(MATMUL_DTYPE)
    # fc2 + ReLU
    h2 = jnp.dot(h1, w2_ref[...], preferred_element_type=jnp.float32)
    h2 = jnp.maximum(h2 + b2_ref[...], 0.0).astype(MATMUL_DTYPE)
    # fc3 (no activation); output last dim is the true num_outputs (masked store).
    out = jnp.dot(h2, w3_ref[...], preferred_element_type=jnp.float32)
    o_ref[...] = (out + b3_ref[...]).astype(o_ref.dtype)


# ------------------------------------------------------------------- one-time param prep
def prepare_params(w1, b1, w2, b2, w3, b3):
    """One-time parameter preparation (hoisted out of the per-call path).

    Weights are (in, out) (transpose of nn.Linear's (out, in)). Hidden feature dims
    are zero-padded to multiples of 128 so the h1/h2 intermediates are lane-dense;
    the input dim (K of w1) and output dim (N of w3) are left at their natural sizes
    so x is read and the output written without padding. Matmul operands are cast to
    MATMUL_DTYPE; biases stay f32 (f32 epilogue). Zero padding keeps padded hidden
    columns exactly zero through bias+ReLU, so results are unchanged.
    """
    D_in, H1 = w1.shape
    H2 = w2.shape[1]
    D_out = w3.shape[1]
    H1p = _round_up(H1, LANE)
    H2p = _round_up(H2, LANE)

    def pad2(a, rows, cols):
        return jnp.pad(a, ((0, rows - a.shape[0]), (0, cols - a.shape[1])))

    w1p = pad2(w1, D_in, H1p).astype(MATMUL_DTYPE)
    w2p = pad2(w2, H1p, H2p).astype(MATMUL_DTYPE)
    w3p = pad2(w3, H2p, D_out).astype(MATMUL_DTYPE)
    b1p = pad2(b1.reshape(1, -1), 1, H1p).astype(jnp.float32)
    b2p = pad2(b2.reshape(1, -1), 1, H2p).astype(jnp.float32)
    b3p = b3.reshape(1, -1).astype(jnp.float32)
    return (w1p, b1p, w2p, b2p, w3p, b3p)


# ------------------------------------------------------------------- tile / VMEM choice
@functools.lru_cache(maxsize=1)
def _vmem_capacity_bytes():
    try:
        return int(pltpu.get_tpu_info().vmem_capacity_bytes)
    except Exception:
        return 64 << 20  # v7x-safe default


def _tile_and_vmem(batch, d_in, h1p, h2p, d_out):
    """Pick the batch tile and vmem_limit from the actual per-row footprint,
    including the compiler-materialized h1/h2 intermediates."""
    elem_w = jnp.dtype(MATMUL_DTYPE).itemsize
    per_row = (
        2 * d_in * 4                 # double-buffered x tiles (f32)
        + d_in * elem_w              # in-kernel x cast
        + 2 * d_out * 4              # double-buffered out tiles (f32)
        + (h1p + h2p) * (4 + elem_w)  # f32 h1/h2 + their MXU-dtype casts
    )
    weight_bytes = ((d_in * h1p + h1p * h2p + h2p * d_out) * elem_w
                    + (h1p + h2p + d_out) * 4)
    resident_bytes = 2 * weight_bytes  # worst case: weights double-buffered

    vmem_cap = _vmem_capacity_bytes()

    # Leave ~half of VMEM as headroom for compiler temporaries.
    budget = max(vmem_cap // 2 - resident_bytes, SUBLANE * per_row)
    rows_by_vmem = max(SUBLANE, (budget // max(per_row, 1)) // SUBLANE * SUBLANE)

    # M=256 already fills the 256-wide MXU (v6e/v7x); larger tiles only amortize
    # the ~0.35us/step grid overhead -> allow up to 1024 rows on 128 MiB-VMEM parts
    # (v5e/v6e), stay at 256 on 64 MiB parts (v7x).
    max_tile = 1024 if vmem_cap >= (96 << 20) else 256
    max_tile = max(SUBLANE, min(max_tile, rows_by_vmem))

    # Even step count (when >1) so v7x's two TensorCores get balanced work under
    # dimension_semantics=("parallel",); tile then divides the batch to within
    # <8 rows of padding (no near-2x padding for awkward batch sizes).
    steps = _cdiv(batch, max_tile)
    if steps > 1 and steps % 2 == 1:
        steps += 1
    bt = _round_up(_cdiv(batch, steps), SUBLANE)

    vmem_est = bt * per_row + resident_bytes
    vmem_limit = int(min((3 * vmem_cap) // 4, max(16 << 20, 2 * vmem_est)))
    return bt, vmem_limit


# ------------------------------------------------------------------------- pallas_call
@functools.partial(jax.jit,
                   static_argnames=("bt", "vmem_limit", "single_buffer_weights"))
def _mlp_forward_padded(x_p, w1, b1, w2, b2, w3, b3, *, bt, vmem_limit,
                        single_buffer_weights):
    B_p, D_in = x_p.shape
    H1p = w1.shape[1]
    H2p = w2.shape[1]
    D_out = w3.shape[1]

    if single_buffer_weights:
        # Constant index_map -> the block never changes; single-buffer it to halve
        # the resident-weight VMEM footprint.
        def resident(r, c):
            return pl.BlockSpec((r, c), lambda i: (0, 0),
                                pipeline_mode=pl.Buffered(1))
    else:
        def resident(r, c):
            return pl.BlockSpec((r, c), lambda i: (0, 0))

    return pl.pallas_call(
        mlp_kernel,
        out_shape=jax.ShapeDtypeStruct((B_p, D_out), jnp.float32),
        grid=(B_p // bt,),
        in_specs=[
            pl.BlockSpec((bt, D_in), lambda i: (i, 0)),  # x tile (full last dim)
            resident(D_in, H1p),   # w1
            resident(1, H1p),      # b1
            resident(H1p, H2p),    # w2
            resident(1, H2p),      # b2
            resident(H2p, D_out),  # w3
            resident(1, D_out),    # b3
        ],
        out_specs=pl.BlockSpec((bt, D_out), lambda i: (i, 0)),
        compiler_params=pltpu.CompilerParams(
            dimension_semantics=("parallel",),
            vmem_limit_bytes=vmem_limit,
        ),
    )(x_p, w1, b1, w2, b2, w3, b3)


_WEIGHT_SINGLE_BUFFER = None  # resolved on the first forward call


def neural_net_forward(x, params):
    """x: (B, input_size) f32. params: output of prepare_params. Returns (B, num_outputs) f32."""
    global _WEIGHT_SINGLE_BUFFER
    w1, b1, w2, b2, w3, b3 = params
    B, D_in = x.shape
    H1p, H2p, D_out = w1.shape[1], w2.shape[1], w3.shape[1]

    bt, vmem_limit = _tile_and_vmem(B, D_in, H1p, H2p, D_out)
    B_p = _round_up(B, bt)
    x_p = x if B_p == B else jnp.pad(x, ((0, B_p - B), (0, 0)))

    kwargs = dict(bt=bt, vmem_limit=vmem_limit)
    if _WEIGHT_SINGLE_BUFFER is None:
        try:
            out = _mlp_forward_padded(x_p, *params, single_buffer_weights=True, **kwargs)
            jax.block_until_ready(out)
            _WEIGHT_SINGLE_BUFFER = True
        except Exception:
            # This JAX/libtpu rejects Buffered(1); fall back to default buffering.
            _WEIGHT_SINGLE_BUFFER = False
            out = _mlp_forward_padded(x_p, *params, single_buffer_weights=False, **kwargs)
    else:
        out = _mlp_forward_padded(x_p, *params,
                                  single_buffer_weights=_WEIGHT_SINGLE_BUFFER, **kwargs)

    # Padded batch rows (if any) contain relu(bias) garbage; slice them off here.
    return out if B_p == B else out[:B]


# ----------------------------------------------------------------------------- helpers
def init_linear_params(key, fan_in, fan_out):
    """Mimics nn.Linear's U(-1/sqrt(fan_in), 1/sqrt(fan_in)); weight laid out (in, out)."""
    k_w, k_b = jax.random.split(key)
    bound = 1.0 / jnp.sqrt(fan_in)
    w = jax.random.uniform(k_w, (fan_in, fan_out), jnp.float32, -bound, bound)
    b = jax.random.uniform(k_b, (1, fan_out), jnp.float32, -bound, bound)
    return w, b


def reference_forward(x, w1, b1, w2, b2, w3, b3):
    h1 = jnp.maximum(x @ w1 + b1, 0.0)
    h2 = jnp.maximum(h1 @ w2 + b2, 0.0)
    return h2 @ w3 + b3


# TODO(synk): fit()/predict() training utilities (optimizer loop, Huber loss, plotting)
# are host-side orchestration, not kernel work, and are intentionally not ported.

if __name__ == "__main__":
    # Small shapes consistent with the module:
    # NeuralNet(input_size=32, hidden_size_1=64, hidden_size_2=64, num_outputs=8)
    batch = 8
    input_size = 32
    hidden_size_1 = 64
    hidden_size_2 = 64
    num_outputs = 8

    key = jax.random.PRNGKey(0)
    kx, k1, k2, k3 = jax.random.split(key, 4)

    x = jax.random.normal(kx, (batch, input_size), jnp.float32)
    w1, b1 = init_linear_params(k1, input_size, hidden_size_1)
    w2, b2 = init_linear_params(k2, hidden_size_1, hidden_size_2)
    w3, b3 = init_linear_params(k3, hidden_size_2, num_outputs)

    # One-time parameter preparation (hoisted out of the forward path).
    params = jax.block_until_ready(prepare_params(w1, b1, w2, b2, w3, b3))

    out = neural_net_forward(x, params)
    out = jax.block_until_ready(out)

    ref = reference_forward(x, w1, b1, w2, b2, w3, b3)
    assert out.shape == (batch, num_outputs)
    # bf16 matmul operands with f32 accumulation -> compare at bf16 tolerance.
    assert jnp.allclose(out, ref, atol=2e-2, rtol=2e-2), "mismatch vs reference"

    print("KERNEL_OK")
</pallas_src>

<mosaic_0001>
module attributes {stable_mosaic.version = 11 : i64} {
  func.func @mlp_kernel(%arg0: i32, %arg1: memref<8x32xf32, #tpu.memory_space<vmem>>, %arg2: memref<32x128xbf16, #tpu.memory_space<vmem>>, %arg3: memref<1x128xf32, #tpu.memory_space<vmem>>, %arg4: memref<128x128xbf16, #tpu.memory_space<vmem>>, %arg5: memref<1x128xf32, #tpu.memory_space<vmem>>, %arg6: memref<128x8xbf16, #tpu.memory_space<vmem>>, %arg7: memref<1x8xf32, #tpu.memory_space<vmem>>, %arg8: memref<8x8xf32, #tpu.memory_space<vmem>>) attributes {dimension_semantics = [#tpu.dimension_semantics<parallel>], iteration_bounds = array<i64: 1>, scalar_prefetch = 0 : i64, scratch_operands = 0 : i64, tpu.core_type = #tpu.core_type<tc>, window_params = [{transform_indices = @transform_0, window_bounds = array<i64: 8, 32>}, {pipeline_mode = #tpu.pipeline_mode<synchronous>, transform_indices = @transform_1, window_bounds = array<i64: 32, 128>}, {pipeline_mode = #tpu.pipeline_mode<synchronous>, transform_indices = @transform_2, window_bounds = array<i64: 1, 128>}, {pipeline_mode = #tpu.pipeline_mode<synchronous>, transform_indices = @transform_3, window_bounds = array<i64: 128, 128>}, {pipeline_mode = #tpu.pipeline_mode<synchronous>, transform_indices = @transform_4, window_bounds = array<i64: 1, 128>}, {pipeline_mode = #tpu.pipeline_mode<synchronous>, transform_indices = @transform_5, window_bounds = array<i64: 128, 8>}, {pipeline_mode = #tpu.pipeline_mode<synchronous>, transform_indices = @transform_6, window_bounds = array<i64: 1, 8>}, {transform_indices = @transform_7, window_bounds = array<i64: 8, 8>}]} {
    %c0 = arith.constant 0 : index
    %c0_0 = arith.constant 0 : index
    %0 = vector.load %arg1[%c0, %c0_0] : memref<8x32xf32, #tpu.memory_space<vmem>>, vector<8x32xf32>
    %1 = arith.truncf %0 : vector<8x32xf32> to vector<8x32xbf16>
    %c0_1 = arith.constant 0 : index
    %c0_2 = arith.constant 0 : index
    %2 = vector.load %arg2[%c0_1, %c0_2] : memref<32x128xbf16, #tpu.memory_space<vmem>>, vector<32x128xbf16>
    %cst = arith.constant dense<0.000000e+00> : vector<8x128xf32>
    %3 = tpu.matmul %1, %2, %cst {dimension_numbers = #tpu.dot_dimension_numbers<[1], [0], [0], [1], [0, 0, 1, 1], [], []>} : vector<8x32xbf16>, vector<32x128xbf16>, vector<8x128xf32> -> vector<8x128xf32>
    %c0_3 = arith.constant 0 : index
    %c0_4 = arith.constant 0 : index
    %4 = vector.load %arg3[%c0_3, %c0_4] : memref<1x128xf32, #tpu.memory_space<vmem>>, vector<1x128xf32>
    %5 = vector.broadcast %4 : vector<1x128xf32> to vector<8x128xf32>
    %6 = arith.addf %3, %5 : vector<8x128xf32>
    %cst_5 = arith.constant 0.000000e+00 : f32
    %7 = vector.broadcast %cst_5 : f32 to vector<8x128xf32>
    %8 = arith.maximumf %6, %7 : vector<8x128xf32>
    %9 = arith.truncf %8 : vector<8x128xf32> to vector<8x128xbf16>
    %c0_6 = arith.constant 0 : index
    %c0_7 = arith.constant 0 : index
    %10 = vector.load %arg4[%c0_6, %c0_7] : memref<128x128xbf16, #tpu.memory_space<vmem>>, vector<128x128xbf16>
    %cst_8 = arith.constant dense<0.000000e+00> : vector<8x128xf32>
    %11 = tpu.matmul %9, %10, %cst_8 {dimension_numbers = #tpu.dot_dimension_numbers<[1], [0], [0], [1], [0, 0, 1, 1], [], []>} : vector<8x128xbf16>, vector<128x128xbf16>, vector<8x128xf32> -> vector<8x128xf32>
    %c0_9 = arith.constant 0 : index
    %c0_10 = arith.constant 0 : index
    %12 = vector.load %arg5[%c0_9, %c0_10] : memref<1x128xf32, #tpu.memory_space<vmem>>, vector<1x128xf32>
    %13 = vector.broadcast %12 : vector<1x128xf32> to vector<8x128xf32>
    %14 = arith.addf %11, %13 : vector<8x128xf32>
    %cst_11 = arith.constant 0.000000e+00 : f32
    %15 = vector.broadcast %cst_11 : f32 to vector<8x128xf32>
    %16 = arith.maximumf %14, %15 : vector<8x128xf32>
    %17 = arith.truncf %16 : vector<8x128xf32> to vector<8x128xbf16>
    %c0_12 = arith.constant 0 : index
    %c0_13 = arith.constant 0 : index
    %18 = vector.load %arg6[%c0_12, %c0_13] : memref<128x8xbf16, #tpu.memory_space<vmem>>, vector<128x8xbf16>
    %cst_14 = arith.constant dense<0.000000e+00> : vector<8x8xf32>
    %19 = tpu.matmul %17, %18, %cst_14 {dimension_numbers = #tpu.dot_dimension_numbers<[1], [0], [0], [1], [0, 0, 1, 1], [], []>} : vector<8x128xbf16>, vector<128x8xbf16>, vector<8x8xf32> -> vector<8x8xf32>
    %c0_15 = arith.constant 0 : index
    %c0_16 = arith.constant 0 : index
    %20 = vector.load %arg7[%c0_15, %c0_16] : memref<1x8xf32, #tpu.memory_space<vmem>>, vector<1x8xf32>
    %21 = vector.broadcast %20 : vector<1x8xf32> to vector<8x8xf32>
    %22 = arith.addf %19, %21 : vector<8x8xf32>
    %c0_17 = arith.constant 0 : index
    %c0_18 = arith.constant 0 : index
    %23 = vector.load %arg8[%c0_17, %c0_18] : memref<8x8xf32, #tpu.memory_space<vmem>>, vector<8x8xf32>
    tpu.vector_store %arg8[%c0_17, %c0_18], %22 {strides = array<i32>} : memref<8x8xf32, #tpu.memory_space<vmem>>, vector<8x8xf32>,
    return
  }
  func.func @transform_0(%arg0: i32) -> (i32, i32) {
    %c0_i32 = arith.constant 0 : i32
    %c0_i32_0 = arith.constant 0 : i32
    return %arg0, %c0_i32 : i32, i32
  }
  func.func @transform_1(%arg0: i32) -> (i32, i32) {
    %c0_i32 = arith.constant 0 : i32
    %c0_i32_0 = arith.constant 0 : i32
    %c0_i32_1 = arith.constant 0 : i32
    return %c0_i32, %c0_i32_0 : i32, i32
  }
  func.func @transform_2(%arg0: i32) -> (i32, i32) {
    %c0_i32 = arith.constant 0 : i32
    %c0_i32_0 = arith.constant 0 : i32
    %c0_i32_1 = arith.constant 0 : i32
    return %c0_i32, %c0_i32_0 : i32, i32
  }
  func.func @transform_3(%arg0: i32) -> (i32, i32) {
    %c0_i32 = arith.constant 0 : i32
    %c0_i32_0 = arith.constant 0 : i32
    %c0_i32_1 = arith.constant 0 : i32
    return %c0_i32, %c0_i32_0 : i32, i32
  }
  func.func @transform_4(%arg0: i32) -> (i32, i32) {
    %c0_i32 = arith.constant 0 : i32
    %c0_i32_0 = arith.constant 0 : i32
    %c0_i32_1 = arith.constant 0 : i32
    return %c0_i32, %c0_i32_0 : i32, i32
  }
  func.func @transform_5(%arg0: i32) -> (i32, i32) {
    %c0_i32 = arith.constant 0 : i32
    %c0_i32_0 = arith.constant 0 : i32
    %c0_i32_1 = arith.constant 0 : i32
    return %c0_i32, %c0_i32_0 : i32, i32
  }
  func.func @transform_6(%arg0: i32) -> (i32, i32) {
    %c0_i32 = arith.constant 0 : i32
    %c0_i32_0 = arith.constant 0 : i32
    %c0_i32_1 = arith.constant 0 : i32
    return %c0_i32, %c0_i32_0 : i32, i32
  }
  func.func @transform_7(%arg0: i32) -> (i32, i32) {
    %c0_i32 = arith.constant 0 : i32
    %c0_i32_0 = arith.constant 0 : i32
    return %arg0, %c0_i32 : i32, i32
  }
}

module attributes {stable_mosaic.version = 11 : i64} {
  func.func @mlp_kernel(%arg0: i32, %arg1: memref<8x32xf32, #tpu.memory_space<vmem>>, %arg2: memref<32x128xbf16, #tpu.memory_space<vmem>>, %arg3: memref<1x128xf32, #tpu.memory_space<vmem>>, %arg4: memref<128x128xbf16, #tpu.memory_space<vmem>>, %arg5: memref<1x128xf32, #tpu.memory_space<vmem>>, %arg6: memref<128x8xbf16, #tpu.memory_space<vmem>>, %arg7: memref<1x8xf32, #tpu.memory_space<vmem>>, %arg8: memref<8x8xf32, #tpu.memory_space<vmem>>) attributes {dimension_semantics = [#tpu.dimension_semantics<parallel>], iteration_bounds = array<i64: 1>, scalar_prefetch = 0 : i64, scratch_operands = 0 : i64, tpu.core_type = #tpu.core_type<tc>, window_params = [{transform_indices = @transform_0, window_bounds = array<i64: 8, 32>}, {pipeline_mode = #tpu.pipeline_mode<synchronous>, transform_indices = @transform_1, window_bounds = array<i64: 32, 128>}, {pipeline_mode = #tpu.pipeline_mode<synchronous>, transform_indices = @transform_2, window_bounds = array<i64: 1, 128>}, {pipeline_mode = #tpu.pipeline_mode<synchronous>, transform_indices = @transform_3, window_bounds = array<i64: 128, 128>}, {pipeline_mode = #tpu.pipeline_mode<synchronous>, transform_indices = @transform_4, window_bounds = array<i64: 1, 128>}, {pipeline_mode = #tpu.pipeline_mode<synchronous>, transform_indices = @transform_5, window_bounds = array<i64: 128, 8>}, {pipeline_mode = #tpu.pipeline_mode<synchronous>, transform_indices = @transform_6, window_bounds = array<i64: 1, 8>}, {transform_indices = @transform_7, window_bounds = array<i64: 8, 8>}]} {
    %c0 = arith.constant 0 : index
    %c0_0 = arith.constant 0 : index
    %0 = vector.load %arg1[%c0, %c0_0] : memref<8x32xf32, #tpu.memory_space<vmem>>, vector<8x32xf32>
    %1 = arith.truncf %0 : vector<8x32xf32> to vector<8x32xbf16>
    %c0_1 = arith.constant 0 : index
    %c0_2 = arith.constant 0 : index
    %2 = vector.load %arg2[%c0_1, %c0_2] : memref<32x128xbf16, #tpu.memory_space<vmem>>, vector<32x128xbf16>
    %cst = arith.constant dense<0.000000e+00> : vector<8x128xf32>
    %3 = tpu.matmul %1, %2, %cst {dimension_numbers = #tpu.dot_dimension_numbers<[1], [0], [0], [1], [0, 0, 1, 1], [], []>} : vector<8x32xbf16>, vector<32x128xbf16>, vector<8x128xf32> -> vector<8x128xf32>
    %c0_3 = arith.constant 0 : index
    %c0_4 = arith.constant 0 : index
    %4 = vector.load %arg3[%c0_3, %c0_4] : memref<1x128xf32, #tpu.memory_space<vmem>>, vector<1x128xf32>
    %5 = vector.broadcast %4 : vector<1x128xf32> to vector<8x128xf32>
    %6 = arith.addf %3, %5 : vector<8x128xf32>
    %cst_5 = arith.constant 0.000000e+00 : f32
    %7 = vector.broadcast %cst_5 : f32 to vector<8x128xf32>
    %8 = arith.maximumf %6, %7 : vector<8x128xf32>
    %9 = arith.truncf %8 : vector<8x128xf32> to vector<8x128xbf16>
    %c0_6 = arith.constant 0 : index
    %c0_7 = arith.constant 0 : index
    %10 = vector.load %arg4[%c0_6, %c0_7] : memref<128x128xbf16, #tpu.memory_space<vmem>>, vector<128x128xbf16>
    %cst_8 = arith.constant dense<0.000000e+00> : vector<8x128xf32>
    %11 = tpu.matmul %9, %10, %cst_8 {dimension_numbers = #tpu.dot_dimension_numbers<[1], [0], [0], [1], [0, 0, 1, 1], [], []>} : vector<8x128xbf16>, vector<128x128xbf16>, vector<8x128xf32> -> vector<8x128xf32>
    %c0_9 = arith.constant 0 : index
    %c0_10 = arith.constant 0 : index
    %12 = vector.load %arg5[%c0_9, %c0_10] : memref<1x128xf32, #tpu.memory_space<vmem>>, vector<1x128xf32>
    %13 = vector.broadcast %12 : vector<1x128xf32> to vector<8x128xf32>
    %14 = arith.addf %11, %13 : vector<8x128xf32>
    %cst_11 = arith.constant 0.000000e+00 : f32
    %15 = vector.broadcast %cst_11 : f32 to vector<8x128xf32>
    %16 = arith.maximumf %14, %15 : vector<8x128xf32>
    %17 = arith.truncf %16 : vector<8x128xf32> to vector<8x128xbf16>
    %c0_12 = arith.constant 0 : index
    %c0_13 = arith.constant 0 : index
    %18 = vector.load %arg6[%c0_12, %c0_13] : memref<128x8xbf16, #tpu.memory_space<vmem>>, vector<128x8xbf16>
    %cst_14 = arith.constant dense<0.000000e+00> : vector<8x8xf32>
    %19 = tpu.matmul %17, %18, %cst_14 {dimension_numbers = #tpu.dot_dimension_numbers<[1], [0], [0], [1], [0, 0, 1, 1], [], []>} : vector<8x128xbf16>, vector<128x8xbf16>, vector<8x8xf32> -> vector<8x8xf32>
    %c0_15 = arith.constant 0 : index
    %c0_16 = arith.constant 0 : index
    %20 = vector.load %arg7[%c0_15, %c0_16] : memref<1x8xf32, #tpu.memory_space<vmem>>, vector<1x8xf32>
    %21 = vector.broadcast %20 : vector<1x8xf32> to vector<8x8xf32>
    %22 = arith.addf %19, %21 : vector<8x8xf32>
    %c0_17 = arith.constant 0 : index
    %c0_18 = arith.constant 0 : index
    %23 = vector.load %arg8[%c0_17, %c0_18] : memref<8x8xf32, #tpu.memory_space<vmem>>, vector<8x8xf32>
    tpu.vector_store %arg8[%c0_17, %c0_18], %22 {strides = array<i32>} : memref<8x8xf32, #tpu.memory_space<vmem>>, vector<8x8xf32>,
    return
  }
  func.func @transform_0(%arg0: i32) -> (i32, i32) {
    %c0_i32 = arith.constant 0 : i32
    %c0_i32_0 = arith.constant 0 : i32
    return %arg0, %c0_i32 : i32, i32
  }
  func.func @transform_1(%arg0: i32) -> (i32, i32) {
    %c0_i32 = arith.constant 0 : i32
    %c0_i32_0 = arith.constant 0 : i32
    %c0_i32_1 = arith.constant 0 : i32
    return %c0_i32, %c0_i32_0 : i32, i32
  }
  func.func @transform_2(%arg0: i32) -> (i32, i32) {
    %c0_i32 = arith.constant 0 : i32
    %c0_i32_0 = arith.constant 0 : i32
    %c0_i32_1 = arith.constant 0 : i32
    return %c0_i32, %c0_i32_0 : i32, i32
  }
  func.func @transform_3(%arg0: i32) -> (i32, i32) {
    %c0_i32 = arith.constant 0 : i32
    %c0_i32_0 = arith.constant 0 : i32
    %c0_i32_1 = arith.constant 0 : i32
    return %c0_i32, %c0_i32_0 : i32, i32
  }
  func.func @transform_4(%arg0: i32) -> (i32, i32) {
    %c0_i32 = arith.constant 0 : i32
    %c0_i32_0 = arith.constant 0 : i32
    %c0_i32_1 = arith.constant 0 : i32
    return %c0_i32, %c0_i32_0 : i32, i32
  }
  func.func @transform_5(%arg0: i32) -> (i32, i32) {
    %c0_i32 = arith.constant 0 : i32
    %c0_i32_0 = arith.constant 0 : i32
    %c0_i32_1 = arith.constant 0 : i32
    return %c0_i32, %c0_i32_0 : i32, i32
  }
  func.func @transform_6(%arg0: i32) -> (i32, i32) {
    %c0_i32 = arith.constant 0 : i32
    %c0_i32_0 = arith.constant 0 : i32
    %c0_i32_1 = arith.constant 0 : i32
    return %c0_i32, %c0_i32_0 : i32, i32
  }
  func.func @transform_7(%arg0: i32) -> (i32, i32) {
    %c0_i32 = arith.constant 0 : i32
    %c0_i32_0 = arith.constant 0 : i32
    return %arg0, %c0_i32 : i32, i32
  }
}

</mosaic_0001>

<bundles_post_ra>
// kernel: _mlp_forward_padded.1
= control target key start
LH: loop header
LB: loop body
LE: loop exit
PB: predicated region body
PF: predicated region fallthrough
CT: control target
= control target key end

     0   :  { %12 = vsyncpa [#allocation3], 0  ;;  %s671_s0 = inlined_call_operand.vmem [shape: f32[8,32], index: 0, kind: input, shape index: {}]   ;;  %s672_s1 = inlined_call_operand.hbm [shape: bf16[32,128], index: 1, kind: input, shape index: {}]   ;;  %s673_s2 = inlined_call_operand.vmem [shape: f32[1,128], index: 2, kind: input, shape index: {}]   ;;  %s674_s3 = inlined_call_operand.vmem [shape: bf16[128,128], index: 3, kind: input, shape index: {}]   ;;  %s675_s4 = inlined_call_operand.vmem [shape: f32[1,128], index: 4, kind: input, shape index: {}]   ;;  %s676_s5 = inlined_call_operand.vmem [shape: bf16[128,8], index: 5, kind: input, shape index: {}]   ;;  %s677_s6 = inlined_call_operand.vmem [shape: f32[1,8], index: 6, kind: input, shape index: {}]   ;;  %s678_s7 = inlined_call_operand.hbm [shape: f32[8,8], index: 7, kind: output, shape index: {}]  }
   0x1   :  { %13 = vsyncpa [#allocation4], 0  ;;  %s517_s24 = smov [#allocation2]   ;;  %s469_s28 = scalar_lea.hbm %s672_s1, 256 }
   0x2   :  { %s21_s25 = sshll.u32 %s517_s24, 4  ;;  %p470_p0 = scmp.ne.s32.totalorder %s672_s1, %s469_s28  ;;  %s22_s25 = int_to_ptr.vmem [resolvable:$true] %s21_s25 }
   0x3   :  { %p473_p1 = scmp.lt.u32.totalorder %s469_s28, %s672_s1 }
   0x5   :  { %p475_p2 = pnand %p473_p1, %p470_p0 }
   0x7   :  { %478 = shalt.err (!%p475_p2)
}
   0x8   :  { %s479_s10 = scalar_lea.vmem %s22_s25, 256  ;;  %p484_p4 = scmp.lt.s32.totalorder %s22_s25, %s22_s25 }
   0x9   :  { %p480_p3 = scmp.ne.s32.totalorder %s22_s25, %s479_s10  ;;  %p485_p5 = scmp.lt.s32.totalorder %s479_s10, %s479_s10 }
   0xb   :  { %p486_p6 = por %p485_p5, %p484_p4 }
   0xd   :  { %p487_p7 = pnand %p486_p6, %p480_p3 }
   0xf   :  { %490 = shalt.err (!%p487_p7)
}
  0x10   :  { %s518_s11 = smov 64   ;;  %s519_s12 = smov 4  }
  0x11   :  { %27 = dma.hbm_to_vmem [thread:$0]  %s672_s1, 256, %s22_s25, [#allocation3], %s518_s11, %s518_s11, %s519_s12  }
  0x12   :  { %513 = dma.done.wait [#allocation3], 256  }
  0x13   :  { %514 = vsyncadd [#allocation3], 4294967040  ;;  %v520_v0 = vmov 0.0   ;;  %vm521_vm0 = vmmov 0   ;;  %v451_v1 = vld [vmem:[#allocation2] sm:$0xff]   ;;  %v452_v2 = vld [vmem:[#allocation2 + $0x8] sm:$0xff]  }
  0x14   :  { %397 = vmatprep.subr.bf16.mxu0 %v520_v0  ;;  %401 = vmatprep.mubr.msk.bf16.mxu0 %vm521_vm0, %v520_v0  ;;  %v42_v3 = vld [vmem:[%s671_s0] sm:$0xff]  ;;  %v454_v6 = vld [vmem:[%s674_s3 + $0x8] sm:$0xff]   ;;  %vm67_vm1 = vcmask 261120   ;;  %v455_v7 = vld [vmem:[%s674_s3 + $0x10] sm:$0xff]   ;;  %s522_s26 = smov [#allocation5]   ;;  %vm337_vm2 = vcmask 64512  }
  0x15   :  { %405 = vmatprep.subr.bf16.mxu1 %v520_v0  ;;  %421 = vmatprep.mubr.msk.bf16.mxu1 %vm521_vm0, %v520_v0  ;;  %v453_v4 = vld [vmem:[%s674_s3] sm:$0xff]   ;;  %v43_v5 = vpack.c.bf16 %v42_v3, %v42_v3  ;;  %v456_v8 = vld [vmem:[%s674_s3 + $0x18] sm:$0xff]   ;;  %v458_v10 = vld [vmem:[%s674_s3 + $0x28] sm:$0xff]   ;;  %s345_s27 = sshll.u32 %s522_s26, 4  ;;  %s346_s27 = int_to_ptr.vmem [resolvable:$true] %s345_s27 }
  0x16   :  { %398 = vmatpush3.bf16.msra.mxu0 %v451_v1  ;;  %406 = vmatpush3.bf16.msra.mxu1 %v453_v4  ;;  %v457_v9 = vld [vmem:[%s674_s3 + $0x20] sm:$0xff]   ;;  %v459_v11 = vld [vmem:[%s674_s3 + $0x30] sm:$0xff]   ;;  %v460_v12 = vld [vmem:[%s674_s3 + $0x38] sm:$0xff]   ;;  %p496_p9 = scmp.lt.s32.totalorder %s346_s27, %s346_s27 }
  0x17   :  { %399 = vmatprep.subr.bf16.mxu0 %v520_v0  ;;  %407 = vmatprep.subr.bf16.mxu1 %v520_v0  ;;  %v461_v13 = vld [vmem:[%s676_s5] sm:$0xff]   ;;  %v462_v14 = vld [vmem:[%s676_s5 + $0x8] sm:$0xff]   ;;  %v463_v15 = vld [vmem:[%s676_s5 + $0x10] sm:$0xff]  }
  0x18   :  { %v464_v16 = vld [vmem:[%s676_s5 + $0x18] sm:$0xff]   ;;  %v465_v17 = vld [vmem:[%s676_s5 + $0x20] sm:$0xff]   ;;  %v466_v18 = vld [vmem:[%s676_s5 + $0x28] sm:$0xff]  }
  0x19   :  { %v354_v19 = vld [vmem:[%s673_s2] ss:$0 sm:$0xff]  ;;  %v467_v27 = vld [vmem:[%s676_s5 + $0x30] sm:$0xff]   ;;  %v468_v28 = vld [vmem:[%s676_s5 + $0x38] sm:$0xff]  }
  0x1a   :  { %400 = vmatpush3.bf16.msra.mxu0 %v452_v2  ;;  %408 = vmatpush3.bf16.msra.mxu1 %v454_v6  ;;  %v358_v29 = vld [vmem:[%s675_s4] ss:$0 sm:$0xff]  ;;  %s491_s4 = scalar_lea.vmem %s346_s27, 128 }
  0x1b   :  { %425 = vmatprep.subr.bf16.mxu0 %v520_v0  ;;  %409 = vmatprep.subr.bf16.mxu1 %v520_v0  ;;  %v367_v37 = vld [vmem:[%s677_s6] ss:$0 sm:$0xff]  ;;  %p492_p8 = scmp.ne.s32.totalorder %s346_s27, %s491_s4  ;;  %p497_p10 = scmp.lt.s32.totalorder %s491_s4, %s491_s4 }
  0x1d   :  { %402 = vmatmul.mubr.msk.bf16.vlgmr.msra.gmra.mrb[0].mxu0 %vm67_vm1, %v43_v5  ;;  %p498_p11 = por %p497_p10, %p496_p9 }
  0x1e   :  { %441 = vmatprep.mubr.msk.bf16.mxu0 %vm521_vm0, %v520_v0  ;;  %410 = vmatpush3.bf16.msra.mxu1 %v455_v7 }
  0x1f   :  { %411 = vmatprep.subr.bf16.mxu1 %v520_v0  ;;  %426 = vmatpush3.bf16.msra.mxu0 %v461_v13  ;;  %p499_p12 = pnand %p498_p11, %p492_p8 }
  0x20   :  { %427 = vmatprep.subr.bf16.mxu0 %v520_v0 }
  0x22   :  { %412 = vmatpush3.bf16.msra.mxu1 %v456_v8 }
  0x23   :  { %413 = vmatprep.subr.bf16.mxu1 %v520_v0  ;;  %428 = vmatpush3.bf16.msra.mxu0 %v462_v14 }
  0x24   :  { %429 = vmatprep.subr.bf16.mxu0 %v520_v0 }
  0x26   :  { %414 = vmatpush3.bf16.msra.mxu1 %v457_v9 }
  0x27   :  { %415 = vmatprep.subr.bf16.mxu1 %v520_v0  ;;  %430 = vmatpush3.bf16.msra.mxu0 %v463_v15 }
  0x28   :  { %431 = vmatprep.subr.bf16.mxu0 %v520_v0 }
  0x2a   :  { %416 = vmatpush3.bf16.msra.mxu1 %v458_v10 }
  0x2b   :  { %417 = vmatprep.subr.bf16.mxu1 %v520_v0  ;;  %432 = vmatpush3.bf16.msra.mxu0 %v464_v16 }
  0x2c   :  { %433 = vmatprep.subr.bf16.mxu0 %v520_v0 }
  0x2e   :  { %418 = vmatpush3.bf16.msra.mxu1 %v459_v11 }
  0x2f   :  { %419 = vmatprep.subr.bf16.mxu1 %v520_v0  ;;  %434 = vmatpush3.bf16.msra.mxu0 %v465_v17 }
  0x30   :  { %435 = vmatprep.subr.bf16.mxu0 %v520_v0 }
  0x32   :  { %420 = vmatpush3.bf16.msra.mxu1 %v460_v12 }
  0x33   :  { %436 = vmatpush3.bf16.msra.mxu0 %v466_v18 }
  0x34   :  { %437 = vmatprep.subr.bf16.mxu0 %v520_v0 }
  0x37   :  { %438 = vmatpush3.bf16.msra.mxu0 %v467_v27 }
  0x38   :  { %439 = vmatprep.subr.bf16.mxu0 %v520_v0 }
  0x3b   :  { %440 = vmatpush3.bf16.msra.mxu0 %v468_v28 }
  0xf0   :  { %v105_v20 = vpop.f32.mrb[0].mxu0 }
  0xf1   :  { %v106_v21 = vadd.f32 %v354_v19, %v105_v20  ;;  %v403_v22 = vpop.f32.mrb[1].mxu0 }
  0xf2   :  { %v108_v23 = vpop.f32.mrb[2].mxu0 }
  0xf3   :  { %v111_v24 = vmax.f32 %v106_v21, 0.0  ;;  %v404_v25 = vpop.f32.mrb[3].mxu0 }
  0xf5   :  { %v112_v26 = vpack.c.bf16 %v111_v24, %v111_v24 }
  0xf7   :  { %422 = vmatmul.mubr.bf16.vlgmr.msra.gmra.mrb[0].mxu1 %v112_v26 }
 0x1ca   :  { %v218_v30 = vpop.f32.mrb[0].mxu1 }
 0x1cb   :  { %v219_v31 = vadd.f32 %v358_v29, %v218_v30  ;;  %v423_v32 = vpop.f32.mrb[1].mxu1 }
 0x1cc   :  { %v221_v33 = vpop.f32.mrb[2].mxu1 }
 0x1cd   :  { %v224_v34 = vmax.f32 %v219_v31, 0.0  ;;  %v424_v35 = vpop.f32.mrb[3].mxu1 }
 0x1cf   :  { %v225_v36 = vpack.c.bf16 %v224_v34, %v224_v34 }
 0x1d1   :  { %442 = vmatmul.mubr.bf16.vlgmr.msra.gmra.mrb[4].mxu0 %v225_v36 }
 0x2a4   :  { %v331_v38 = vpop.f32.mrb[4].mxu0 }
 0x2a5   :  { %v332_v39 = vadd.f32 %v367_v37, %v331_v38  ;;  %v443_v40 = vpop.f32.mrb[5].mxu0 }
 0x2a6   :  { %v334_v41 = vpop.f32.mrb[6].mxu0 }
 0x2a7   :  { %v444_v42 = vpop.f32.mrb[7].mxu0  ;;  %338 = vst.msk [vmem:[#allocation5] sm:$0xff] %vm337_vm2, %v332_v39 }
 0x2a8   :  { %502 = shalt.err (!%p499_p12)
}
 0x2a9   :  { %s503_s6 = scalar_lea.hbm %s678_s7, 128 }
 0x2aa   :  { %p504_p13 = scmp.ne.s32.totalorder %s678_s7, %s503_s6  ;;  %p507_p0 = scmp.lt.u32.totalorder %s503_s6, %s678_s7 }
 0x2ac   :  { %p509_p1 = pnand %p507_p0, %p504_p13 }
 0x2ae   :  { %512 = shalt.err (!%p509_p1)
}
 0x2af   :  { %348 = dma.vmem_to_hbm [thread:$0]  %s346_s27, 128, %s678_s7, [#allocation4]  }
 0x2b0   :  { %515 = dma.done.wait [#allocation4], 128  }
 0x2b1   :  { %516 = vsyncadd [#allocation4], 4294967168 }
 0x2b2   :  { %352 = vsyncpa [#allocation3], 1 }
 0x2b3   :  { %353 = vsyncpa [#allocation4], 1 }

// kernel: _mlp_forward_padded.1
= control target key start
LH: loop header
LB: loop body
LE: loop exit
PB: predicated region body
PF: predicated region fallthrough
CT: control target
= control target key end

     0   :  { %12 = vsyncpa [#allocation3], 0  ;;  %s671_s0 = inlined_call_operand.vmem [shape: f32[8,32], index: 0, kind: input, shape index: {}]   ;;  %s672_s1 = inlined_call_operand.hbm [shape: bf16[32,128], index: 1, kind: input, shape index: {}]   ;;  %s673_s2 = inlined_call_operand.vmem [shape: f32[1,128], index: 2, kind: input, shape index: {}]   ;;  %s674_s3 = inlined_call_operand.vmem [shape: bf16[128,128], index: 3, kind: input, shape index: {}]   ;;  %s675_s4 = inlined_call_operand.vmem [shape: f32[1,128], index: 4, kind: input, shape index: {}]   ;;  %s676_s5 = inlined_call_operand.vmem [shape: bf16[128,8], index: 5, kind: input, shape index: {}]   ;;  %s677_s6 = inlined_call_operand.vmem [shape: f32[1,8], index: 6, kind: input, shape index: {}]   ;;  %s678_s7 = inlined_call_operand.hbm [shape: f32[8,8], index: 7, kind: output, shape index: {}]  }
   0x1   :  { %13 = vsyncpa [#allocation4], 0  ;;  %s517_s24 = smov [#allocation2]   ;;  %s469_s28 = scalar_lea.hbm %s672_s1, 256 }
   0x2   :  { %s21_s25 = sshll.u32 %s517_s24, 4  ;;  %p470_p0 = scmp.ne.s32.totalorder %s672_s1, %s469_s28  ;;  %s22_s25 = int_to_ptr.vmem [resolvable:$true] %s21_s25 }
   0x3   :  { %p473_p1 = scmp.lt.u32.totalorder %s469_s28, %s672_s1 }
   0x5   :  { %p475_p2 = pnand %p473_p1, %p470_p0 }
   0x7   :  { %478 = shalt.err (!%p475_p2)
}
   0x8   :  { %s479_s10 = scalar_lea.vmem %s22_s25, 256  ;;  %p484_p4 = scmp.lt.s32.totalorder %s22_s25, %s22_s25 }
   0x9   :  { %p480_p3 = scmp.ne.s32.totalorder %s22_s25, %s479_s10  ;;  %p485_p5 = scmp.lt.s32.totalorder %s479_s10, %s479_s10 }
   0xb   :  { %p486_p6 = por %p485_p5, %p484_p4 }
   0xd   :  { %p487_p7 = pnand %p486_p6, %p480_p3 }
   0xf   :  { %490 = shalt.err (!%p487_p7)
}
  0x10   :  { %s518_s11 = smov 64   ;;  %s519_s12 = smov 4  }
  0x11   :  { %27 = dma.hbm_to_vmem [thread:$0]  %s672_s1, 256, %s22_s25, [#allocation3], %s518_s11, %s518_s11, %s519_s12  }
  0x12   :  { %513 = dma.done.wait [#allocation3], 256  }
  0x13   :  { %514 = vsyncadd [#allocation3], 4294967040  ;;  %v520_v0 = vmov 0.0   ;;  %vm521_vm0 = vmmov 0   ;;  %v451_v1 = vld [vmem:[#allocation2] sm:$0xff]   ;;  %v452_v2 = vld [vmem:[#allocation2 + $0x8] sm:$0xff]  }
  0x14   :  { %397 = vmatprep.subr.bf16.mxu0 %v520_v0  ;;  %401 = vmatprep.mubr.msk.bf16.mxu0 %vm521_vm0, %v520_v0  ;;  %v42_v3 = vld [vmem:[%s671_s0] sm:$0xff]  ;;  %v454_v6 = vld [vmem:[%s674_s3 + $0x8] sm:$0xff]   ;;  %vm67_vm1 = vcmask 261120   ;;  %v455_v7 = vld [vmem:[%s674_s3 + $0x10] sm:$0xff]   ;;  %s522_s26 = smov [#allocation5]   ;;  %vm337_vm2 = vcmask 64512  }
  0x15   :  { %405 = vmatprep.subr.bf16.mxu1 %v520_v0  ;;  %421 = vmatprep.mubr.msk.bf16.mxu1 %vm521_vm0, %v520_v0  ;;  %v453_v4 = vld [vmem:[%s674_s3] sm:$0xff]   ;;  %v43_v5 = vpack.c.bf16 %v42_v3, %v42_v3  ;;  %v456_v8 = vld [vmem:[%s674_s3 + $0x18] sm:$0xff]   ;;  %v458_v10 = vld [vmem:[%s674_s3 + $0x28] sm:$0xff]   ;;  %s345_s27 = sshll.u32 %s522_s26, 4  ;;  %s346_s27 = int_to_ptr.vmem [resolvable:$true] %s345_s27 }
  0x16   :  { %398 = vmatpush3.bf16.msra.mxu0 %v451_v1  ;;  %406 = vmatpush3.bf16.msra.mxu1 %v453_v4  ;;  %v457_v9 = vld [vmem:[%s674_s3 + $0x20] sm:$0xff]   ;;  %v459_v11 = vld [vmem:[%s674_s3 + $0x30] sm:$0xff]   ;;  %v460_v12 = vld [vmem:[%s674_s3 + $0x38] sm:$0xff]   ;;  %p496_p9 = scmp.lt.s32.totalorder %s346_s27, %s346_s27 }
  0x17   :  { %399 = vmatprep.subr.bf16.mxu0 %v520_v0  ;;  %407 = vmatprep.subr.bf16.mxu1 %v520_v0  ;;  %v461_v13 = vld [vmem:[%s676_s5] sm:$0xff]   ;;  %v462_v14 = vld [vmem:[%s676_s5 + $0x8] sm:$0xff]   ;;  %v463_v15 = vld [vmem:[%s676_s5 + $0x10] sm:$0xff]  }
  0x18   :  { %v464_v16 = vld [vmem:[%s676_s5 + $0x18] sm:$0xff]   ;;  %v465_v17 = vld [vmem:[%s676_s5 + $0x20] sm:$0xff]   ;;  %v466_v18 = vld [vmem:[%s676_s5 + $0x28] sm:$0xff]  }
  0x19   :  { %v354_v19 = vld [vmem:[%s673_s2] ss:$0 sm:$0xff]  ;;  %v467_v27 = vld [vmem:[%s676_s5 + $0x30] sm:$0xff]   ;;  %v468_v28 = vld [vmem:[%s676_s5 + $0x38] sm:$0xff]  }
  0x1a   :  { %400 = vmatpush3.bf16.msra.mxu0 %v452_v2  ;;  %408 = vmatpush3.bf16.msra.mxu1 %v454_v6  ;;  %v358_v29 = vld [vmem:[%s675_s4] ss:$0 sm:$0xff]  ;;  %s491_s4 = scalar_lea.vmem %s346_s27, 128 }
  0x1b   :  { %425 = vmatprep.subr.bf16.mxu0 %v520_v0  ;;  %409 = vmatprep.subr.bf16.mxu1 %v520_v0  ;;  %v367_v37 = vld [vmem:[%s677_s6] ss:$0 sm:$0xff]  ;;  %p492_p8 = scmp.ne.s32.totalorder %s346_s27, %s491_s4  ;;  %p497_p10 = scmp.lt.s32.totalorder %s491_s4, %s491_s4 }
  0x1d   :  { %402 = vmatmul.mubr.msk.bf16.vlgmr.msra.gmra.mrb[0].mxu0 %vm67_vm1, %v43_v5  ;;  %p498_p11 = por %p497_p10, %p496_p9 }
  0x1e   :  { %441 = vmatprep.mubr.msk.bf16.mxu0 %vm521_vm0, %v520_v0  ;;  %410 = vmatpush3.bf16.msra.mxu1 %v455_v7 }
  0x1f   :  { %411 = vmatprep.subr.bf16.mxu1 %v520_v0  ;;  %426 = vmatpush3.bf16.msra.mxu0 %v461_v13  ;;  %p499_p12 = pnand %p498_p11, %p492_p8 }
  0x20   :  { %427 = vmatprep.subr.bf16.mxu0 %v520_v0 }
  0x22   :  { %412 = vmatpush3.bf16.msra.mxu1 %v456_v8 }
  0x23   :  { %413 = vmatprep.subr.bf16.mxu1 %v520_v0  ;;  %428 = vmatpush3.bf16.msra.mxu0 %v462_v14 }
  0x24   :  { %429 = vmatprep.subr.bf16.mxu0 %v520_v0 }
  0x26   :  { %414 = vmatpush3.bf16.msra.mxu1 %v457_v9 }
  0x27   :  { %415 = vmatprep.subr.bf16.mxu1 %v520_v0  ;;  %430 = vmatpush3.bf16.msra.mxu0 %v463_v15 }
  0x28   :  { %431 = vmatprep.subr.bf16.mxu0 %v520_v0 }
  0x2a   :  { %416 = vmatpush3.bf16.msra.mxu1 %v458_v10 }
  0x2b   :  { %417 = vmatprep.subr.bf16.mxu1 %v520_v0  ;;  %432 = vmatpush3.bf16.msra.mxu0 %v464_v16 }
  0x2c   :  { %433 = vmatprep.subr.bf16.mxu0 %v520_v0 }
  0x2e   :  { %418 = vmatpush3.bf16.msra.mxu1 %v459_v11 }
  0x2f   :  { %419 = vmatprep.subr.bf16.mxu1 %v520_v0  ;;  %434 = vmatpush3.bf16.msra.mxu0 %v465_v17 }
  0x30   :  { %435 = vmatprep.subr.bf16.mxu0 %v520_v0 }
  0x32   :  { %420 = vmatpush3.bf16.msra.mxu1 %v460_v12 }
  0x33   :  { %436 = vmatpush3.bf16.msra.mxu0 %v466_v18 }
  0x34   :  { %437 = vmatprep.subr.bf16.mxu0 %v520_v0 }
  0x37   :  { %438 = vmatpush3.bf16.msra.mxu0 %v467_v27 }
  0x38   :  { %439 = vmatprep.subr.bf16.mxu0 %v520_v0 }
  0x3b   :  { %440 = vmatpush3.bf16.msra.mxu0 %v468_v28 }
  0xf0   :  { %v105_v20 = vpop.f32.mrb[0].mxu0 }
  0xf1   :  { %v106_v21 = vadd.f32 %v354_v19, %v105_v20  ;;  %v403_v22 = vpop.f32.mrb[1].mxu0 }
  0xf2   :  { %v108_v23 = vpop.f32.mrb[2].mxu0 }
  0xf3   :  { %v111_v24 = vmax.f32 %v106_v21, 0.0  ;;  %v404_v25 = vpop.f32.mrb[3].mxu0 }
  0xf5   :  { %v112_v26 = vpack.c.bf16 %v111_v24, %v111_v24 }
  0xf7   :  { %422 = vmatmul.mubr.bf16.vlgmr.msra.gmra.mrb[0].mxu1 %v112_v26 }
 0x1ca   :  { %v218_v30 = vpop.f32.mrb[0].mxu1 }
 0x1cb   :  { %v219_v31 = vadd.f32 %v358_v29, %v218_v30  ;;  %v423_v32 = vpop.f32.mrb[1].mxu1 }
 0x1cc   :  { %v221_v33 = vpop.f32.mrb[2].mxu1 }
 0x1cd   :  { %v224_v34 = vmax.f32 %v219_v31, 0.0  ;;  %v424_v35 = vpop.f32.mrb[3].mxu1 }
 0x1cf   :  { %v225_v36 = vpack.c.bf16 %v224_v34, %v224_v34 }
 0x1d1   :  { %442 = vmatmul.mubr.bf16.vlgmr.msra.gmra.mrb[4].mxu0 %v225_v36 }
 0x2a4   :  { %v331_v38 = vpop.f32.mrb[4].mxu0 }
 0x2a5   :  { %v332_v39 = vadd.f32 %v367_v37, %v331_v38  ;;  %v443_v40 = vpop.f32.mrb[5].mxu0 }
 0x2a6   :  { %v334_v41 = vpop.f32.mrb[6].mxu0 }
 0x2a7   :  { %v444_v42 = vpop.f32.mrb[7].mxu0  ;;  %338 = vst.msk [vmem:[#allocation5] sm:$0xff] %vm337_vm2, %v332_v39 }
 0x2a8   :  { %502 = shalt.err (!%p499_p12)
}
 0x2a9   :  { %s503_s6 = scalar_lea.hbm %s678_s7, 128 }
 0x2aa   :  { %p504_p13 = scmp.ne.s32.totalorder %s678_s7, %s503_s6  ;;  %p507_p0 = scmp.lt.u32.totalorder %s503_s6, %s678_s7 }
 0x2ac   :  { %p509_p1 = pnand %p507_p0, %p504_p13 }
 0x2ae   :  { %512 = shalt.err (!%p509_p1)
}
 0x2af   :  { %348 = dma.vmem_to_hbm [thread:$0]  %s346_s27, 128, %s678_s7, [#allocation4]  }
 0x2b0   :  { %515 = dma.done.wait [#allocation4], 128  }
 0x2b1   :  { %516 = vsyncadd [#allocation4], 4294967168 }
 0x2b2   :  { %352 = vsyncpa [#allocation3], 1 }
 0x2b3   :  { %353 = vsyncpa [#allocation4], 1 }

</bundles_post_ra>
